<compile_context>
chip_gen: v7x
topology: tpu7x:2x2x1
jax: 0.10.0
libtpu: 0.0.40
codegen_flags: <defaults>
</compile_context>

<pallas_src>
import math

import jax
import jax.numpy as jnp
from jax.experimental import pallas as pl
from jax.experimental.pallas import tpu as pltpu

_LANE = 128
_PER_BUFFER_BYTES = 4 * 1024 * 1024      # ~4 MiB per pipelined buffer (2-8 MiB sweet spot)
_VMEM_LIMIT_BYTES = 32 * 1024 * 1024     # safe scoped-VMEM ceiling on v5e/v6e/v7x
_SMALL_INPUT_BYTES = 256 * 1024          # below this, a fused XLA multiply is faster


def _rescale_kernel(w_ref, x_ref, o_ref):
    # w_ref: (1, TW) — broadcasts over the sublane (row) axis.
    # x_ref / o_ref: (TN, TW)
    o_ref[...] = x_ref[...] * w_ref[...]


def _sublane_multiple(dtype) -> int:
    itemsize = jnp.dtype(dtype).itemsize
    return max(8, 32 // max(itemsize, 1))   # 8 for f32, 16 for bf16, 32 for int8


def _round_up(a: int, m: int) -> int:
    return ((a + m - 1) // m) * m


def rescale_tabular(x: jax.Array, weight: jax.Array, *, force_pallas: bool = False) -> jax.Array:
    """out[n, d] = weight[d] * x[n, d]  (RescaleTabular.forward)."""
    N, D = x.shape
    assert weight.shape == (D,)

    out_dtype = jnp.result_type(x.dtype, weight.dtype)

    # ---- small-input fast path: launch + per-step overhead dwarfs ~KiB of work.
    if not force_pallas and N * D * jnp.dtype(out_dtype).itemsize < _SMALL_INPUT_BYTES:
        return weight.astype(out_dtype)[None, :] * x.astype(out_dtype)

    xw = x.astype(out_dtype)
    wv = weight.astype(out_dtype)
    itemsize = jnp.dtype(out_dtype).itemsize
    sub = _sublane_multiple(out_dtype)

    # ---- lane-dense packing: fold k rows into one so the last dim is a
    # multiple of 128 (unmasked stores) and reasonably wide (>= 512 lanes).
    if D % _LANE == 0:
        k = 1
    else:
        k = _LANE // math.gcd(D, _LANE)
        while k * D < 512 and k < 64:
            k *= 2
    W = k * D

    n_pad = _round_up(N, k)
    if n_pad != N:
        xw = jnp.pad(xw, ((0, n_pad - N), (0, 0)))
    xp = xw.reshape(n_pad // k, W)
    wp = (jnp.tile(wv, k) if k > 1 else wv).reshape(1, W)
    Np = xp.shape[0]

    # ---- auto tile picker (rows): largest sublane-multiple tile whose
    # double-buffered in+out footprint fits the per-buffer budget.
    # TODO(synk): for extremely wide W (>~1M f32 lanes) also tile the lane axis.
    rows_cap = max(_PER_BUFFER_BYTES // (W * itemsize), 1)
    tn = max((rows_cap // sub) * sub, sub)
    rows_rounded = _round_up(Np, sub)
    tn = min(tn, rows_rounded)
    # Prefer >= 2 grid steps so v7x's two TensorCores both get work.
    if tn >= rows_rounded and rows_rounded >= 2 * sub:
        tn = _round_up((rows_rounded + 1) // 2, sub)

    num_steps = -(-rows_rounded // tn)
    np_pad = num_steps * tn
    if np_pad != Np:
        xp = jnp.pad(xp, ((0, np_pad - Np), (0, 0)))

    out_packed = pl.pallas_call(
        _rescale_kernel,
        out_shape=jax.ShapeDtypeStruct((np_pad, W), out_dtype),
        grid_spec=pltpu.PrefetchScalarGridSpec(
            num_scalar_prefetch=0,
            grid=(num_steps,),
            in_specs=[
                pl.BlockSpec((1, W), lambda i: (0, 0)),    # weight row, reused every step
                pl.BlockSpec((tn, W), lambda i: (i, 0)),   # x row-tile
            ],
            out_specs=pl.BlockSpec((tn, W), lambda i: (i, 0)),
        ),
        compiler_params=pltpu.CompilerParams(
            dimension_semantics=("parallel",),
            vmem_limit_bytes=_VMEM_LIMIT_BYTES,
        ),
    )(wp, xp)

    return out_packed[:Np].reshape(n_pad, D)[:N]


if __name__ == "__main__":
    key = jax.random.PRNGKey(0)

    # Tabular shape implied by the module: batch N=8, features D=32.
    N, D = 8, 32
    weight = jnp.ones((D,), dtype=jnp.float32)  # nn.Parameter(torch.ones(D))
    x = jax.random.normal(key, (N, D), dtype=jnp.float32)

    # Force the Pallas path even at this tiny size so the kernel itself runs.
    out = jax.block_until_ready(rescale_tabular(x, weight, force_pallas=True))
    ref = weight[None, :] * x
    assert out.shape == (N, D)
    assert out.dtype == ref.dtype
    assert jnp.allclose(out, ref, atol=1e-6, rtol=1e-6)

    # Exercise the auto-tiled, multi-step path: non-multiple-of-128 feature dim,
    # non-trivial weight, batch not a multiple of the tile size.
    key2, key3 = jax.random.split(jax.random.PRNGKey(1))
    N2, D2 = 1000, 96
    w2 = jax.random.normal(key2, (D2,), dtype=jnp.float32)
    x2 = jax.random.normal(key3, (N2, D2), dtype=jnp.float32)
    out2 = jax.block_until_ready(rescale_tabular(x2, w2, force_pallas=True))
    ref2 = w2[None, :] * x2
    assert jnp.allclose(out2, ref2, atol=1e-5, rtol=1e-5)

    # Small-input fast path (fused XLA multiply, no pallas_call).
    out3 = jax.block_until_ready(rescale_tabular(x, weight))
    assert jnp.allclose(out3, ref, atol=1e-6, rtol=1e-6)

    print("KERNEL_OK")
</pallas_src>

<mosaic_0001>
module attributes {stable_mosaic.version = 11 : i64} {
  func.func @_rescale_kernel(%arg0: i32, %arg1: memref<1x512xf32, #tpu.memory_space<vmem>>, %arg2: memref<8x512xf32, #tpu.memory_space<vmem>>, %arg3: memref<8x512xf32, #tpu.memory_space<vmem>>) attributes {dimension_semantics = [#tpu.dimension_semantics<parallel>], iteration_bounds = array<i64: 1>, scalar_prefetch = 0 : i64, scratch_operands = 0 : i64, tpu.core_type = #tpu.core_type<tc>, window_params = [{pipeline_mode = #tpu.pipeline_mode<synchronous>, transform_indices = @transform_0, window_bounds = array<i64: 1, 512>}, {transform_indices = @transform_1, window_bounds = array<i64: 8, 512>}, {transform_indices = @transform_2, window_bounds = array<i64: 8, 512>}]} {
    %c0 = arith.constant 0 : index
    %c0_0 = arith.constant 0 : index
    %0 = vector.load %arg2[%c0, %c0_0] : memref<8x512xf32, #tpu.memory_space<vmem>>, vector<8x512xf32>
    %c0_1 = arith.constant 0 : index
    %c0_2 = arith.constant 0 : index
    %1 = vector.load %arg1[%c0_1, %c0_2] : memref<1x512xf32, #tpu.memory_space<vmem>>, vector<1x512xf32>
    %2 = vector.broadcast %1 : vector<1x512xf32> to vector<8x512xf32>
    %3 = arith.mulf %0, %2 : vector<8x512xf32>
    %c0_3 = arith.constant 0 : index
    %c0_4 = arith.constant 0 : index
    %4 = vector.load %arg3[%c0_3, %c0_4] : memref<8x512xf32, #tpu.memory_space<vmem>>, vector<8x512xf32>
    tpu.vector_store %arg3[%c0_3, %c0_4], %3 {strides = array<i32>} : memref<8x512xf32, #tpu.memory_space<vmem>>, vector<8x512xf32>,
    return
  }
  func.func @transform_0(%arg0: i32) -> (i32, i32) {
    %c0_i32 = arith.constant 0 : i32
    %c0_i32_0 = arith.constant 0 : i32
    %c0_i32_1 = arith.constant 0 : i32
    return %c0_i32, %c0_i32_0 : i32, i32
  }
  func.func @transform_1(%arg0: i32) -> (i32, i32) {
    %c0_i32 = arith.constant 0 : i32
    %c0_i32_0 = arith.constant 0 : i32
    return %arg0, %c0_i32 : i32, i32
  }
  func.func @transform_2(%arg0: i32) -> (i32, i32) {
    %c0_i32 = arith.constant 0 : i32
    %c0_i32_0 = arith.constant 0 : i32
    return %arg0, %c0_i32 : i32, i32
  }
}

</mosaic_0001>

<bundles_post_ra>
// kernel: tpu_custom_call.1
= control target key start
LH: loop header
LB: loop body
LE: loop exit
PB: predicated region body
PF: predicated region fallthrough
CT: control target
= control target key end

     0   :  { %7 = vsyncpa [#allocation3], 0  ;;  %s215_s0 = inlined_call_operand.hbm [shape: f32[1,512], index: 0, kind: input, shape index: {}]   ;;  %s216_s1 = inlined_call_operand.hbm [shape: f32[8,512], index: 1, kind: input, shape index: {}]   ;;  %s217_s2 = inlined_call_operand.hbm [shape: f32[8,512], index: 2, kind: output, shape index: {}]  }
   0x1   :  { %8 = vsyncpa [#allocation6], 0 }
   0x2   :  { %9 = vsyncpa [#allocation4], 0  ;;  %s161_s9 = smov [#allocation2]   ;;  %s162_s11 = smov [#allocation5]  }
   0x3   :  { %s16_s10 = sshll.u32 %s161_s9, 4  ;;  %s26_s12 = sshll.u32 %s162_s11, 4  ;;  %s17_s10 = int_to_ptr.vmem [resolvable:$true] %s16_s10  ;;  %s27_s12 = int_to_ptr.vmem [resolvable:$true] %s26_s12 }
   0x4   :  { %s89_s15 = scalar_lea.hbm %s215_s0, 64 }
   0x5   :  { %p90_p0 = scmp.ne.s32.totalorder %s215_s0, %s89_s15  ;;  %p93_p1 = scmp.lt.u32.totalorder %s89_s15, %s215_s0 }
   0x7   :  { %p95_p2 = pnand %p93_p1, %p90_p0 }
   0x9   :  { %98 = shalt.err (!%p95_p2)
}
   0xa   :  { %s99_s20 = scalar_lea.vmem %s17_s10, 64  ;;  %p104_p4 = scmp.lt.s32.totalorder %s17_s10, %s17_s10 }
   0xb   :  { %p100_p3 = scmp.ne.s32.totalorder %s17_s10, %s99_s20  ;;  %p105_p5 = scmp.lt.s32.totalorder %s99_s20, %s99_s20 }
   0xd   :  { %p106_p6 = por %p105_p5, %p104_p4 }
   0xf   :  { %p107_p7 = pnand %p106_p6, %p100_p3 }
  0x11   :  { %110 = shalt.err (!%p107_p7)
}
  0x12   :  { %19 = dma.hbm_to_vmem [thread:$0]  %s215_s0, 64, %s17_s10, [#allocation3]  }
  0x13   :  { %s111_s25 = scalar_lea.hbm %s216_s1, 512 }
  0x14   :  { %p112_p8 = scmp.ne.s32.totalorder %s216_s1, %s111_s25  ;;  %p115_p9 = scmp.lt.u32.totalorder %s111_s25, %s216_s1 }
  0x16   :  { %p117_p10 = pnand %p115_p9, %p112_p8 }
  0x18   :  { %120 = shalt.err (!%p117_p10)
}
  0x19   :  { %s121_s30 = scalar_lea.vmem %s27_s12, 512  ;;  %p126_p12 = scmp.lt.s32.totalorder %s27_s12, %s27_s12 }
  0x1a   :  { %p122_p11 = scmp.ne.s32.totalorder %s27_s12, %s121_s30  ;;  %p127_p13 = scmp.lt.s32.totalorder %s121_s30, %s121_s30 }
  0x1c   :  { %p128_p0 = por %p127_p13, %p126_p12 }
  0x1e   :  { %p129_p1 = pnand %p128_p0, %p122_p11 }
  0x20   :  { %132 = shalt.err (!%p129_p1)
}
  0x21   :  { %29 = dma.hbm_to_vmem [thread:$0]  %s216_s1, 512, %s27_s12, [#allocation6]  }
  0x22   :  { %155 = dma.done.wait [#allocation3], 64  }
  0x23   :  { %156 = vsyncadd [#allocation3], 4294967232 }
  0x24   :  { %157 = dma.done.wait [#allocation6], 512  }
  0x25   :  { %158 = vsyncadd [#allocation6], 4294966784  ;;  %v42_v0 = vlaneseq  ;;  %v36_v6 = vld [vmem:[#allocation5] sm:$0xff]  ;;  %v40_v7 = vld [vmem:[#allocation2] sm:$0xf]  ;;  %s163_s4 = smov [#allocation7]  }
  0x26   :  { %v37_v8 = vld [vmem:[#allocation5 + $0x8] sm:$0xff]  ;;  %s76_s5 = sshll.u32 %s163_s4, 4  ;;  %v38_v11 = vld [vmem:[#allocation5 + $0x10] sm:$0xff]  ;;  %v39_v13 = vld [vmem:[#allocation5 + $0x18] sm:$0xff]  ;;  %s77_s5 = int_to_ptr.vmem [resolvable:$true] %s76_s5 }
  0x27   :  { %v43_v1 = vshrl.u32 %v42_v0, 7  ;;  %s133_s1 = scalar_lea.vmem %s77_s5, 512  ;;  %p138_p3 = scmp.lt.s32.totalorder %s77_s5, %s77_s5 }
  0x28   :  { %p134_p2 = scmp.ne.s32.totalorder %s77_s5, %s133_s1  ;;  %p139_p4 = scmp.lt.s32.totalorder %s133_s1, %s133_s1 }
  0x29   :  { %v44_v2 = vsub.s32 0, %v43_v1  ;;  %v48_v3 = vsub.s32 1, %v43_v1  ;;  %v52_v4 = vsub.s32 2, %v43_v1  ;;  %v56_v5 = vsub.s32 3, %v43_v1 }
  0x2a   :  { %p140_p5 = por %p139_p4, %p138_p3 }
  0x2b   :  { %v45_v9 = vrot.slane %v40_v7, %v44_v2  ;;  %v49_v10 = vrot.slane %v40_v7, %v48_v3  ;;  %v53_v12 = vrot.slane %v40_v7, %v52_v4  ;;  %v57_v14 = vrot.slane %v40_v7, %v56_v5 }
  0x2c   :  { %p141_p6 = pnand %p140_p5, %p134_p2 }
  0x2d   :  { %v62_v15 = vmul.f32 %v45_v9, %v36_v6  ;;  %v63_v16 = vmul.f32 %v49_v10, %v37_v8  ;;  %v64_v17 = vmul.f32 %v53_v12, %v38_v11  ;;  %v65_v18 = vmul.f32 %v57_v14, %v39_v13 }
  0x2f   :  { %66 = vst [vmem:[#allocation7] sm:$0xff] %v62_v15  ;;  %67 = vst [vmem:[#allocation7 + $0x8] sm:$0xff] %v63_v16 }
  0x30   :  { %68 = vst [vmem:[#allocation7 + $0x10] sm:$0xff] %v64_v17  ;;  %69 = vst [vmem:[#allocation7 + $0x18] sm:$0xff] %v65_v18 }
  0x31   :  { %144 = shalt.err (!%p141_p6)
}
  0x32   :  { %s145_s8 = scalar_lea.hbm %s217_s2, 512 }
  0x33   :  { %p146_p7 = scmp.ne.s32.totalorder %s217_s2, %s145_s8  ;;  %p149_p8 = scmp.lt.u32.totalorder %s145_s8, %s217_s2 }
  0x35   :  { %p151_p9 = pnand %p149_p8, %p146_p7 }
  0x37   :  { %154 = shalt.err (!%p151_p9)
}
  0x38   :  { %79 = dma.vmem_to_hbm [thread:$0]  %s77_s5, 512, %s217_s2, [#allocation4]  }
  0x39   :  { %159 = dma.done.wait [#allocation4], 512  }
  0x3a   :  { %160 = vsyncadd [#allocation4], 4294966784 }
  0x3b   :  { %83 = vsyncpa [#allocation3], 1 }
  0x3c   :  { %84 = vsyncpa [#allocation6], 1 }
  0x3d   :  { %85 = vsyncpa [#allocation4], 1 }

</bundles_post_ra>
